<compile_context>
chip_gen: v7x
topology: tpu7x:2x2x1
jax: 0.10.0
libtpu: 0.0.40
codegen_flags: <defaults>
</compile_context>

<pallas_src>
import functools

import jax
import jax.numpy as jnp
from jax.experimental import pallas as pl
from jax.experimental.pallas import tpu as pltpu

_LANE = 128          # lane width (last-dim alignment)
_SUBLANE_BF16 = 16   # sublane packing for bf16 (second-to-last dim alignment)


def _round_up(v, m):
    return (v + m - 1) // m * m


def _fused_mlp_kernel(x_ref, w_ref, b_ref, o_ref, act_ref):
    """One grid step = one layer for one M tile.

    x_ref:   (tm, Dp)     bf16  input tile (block index constant over layer axis)
    w_ref:   (Dp, Dp)     bf16  layer-l weight, pre-transposed to (K, N)
    b_ref:   (1, Dp)      f32   layer-l bias
    o_ref:   (tm, Dp)     f32   output tile (resident across the layer axis)
    act_ref: (2, tm, Dp)  bf16  ping-pong activation scratch (persists across steps)
    """
    l = pl.program_id(1)
    n_layers = pl.num_programs(1)
    slot_in = l % 2
    slot_out = (l + 1) % 2

    # First layer of this M tile: seed the activation buffer from the input.
    @pl.when(l == 0)
    def _():
        act_ref[0] = x_ref[...]

    # bf16 x bf16 -> f32 on the MXU; epilogue in f32.
    y = jnp.dot(act_ref[slot_in], w_ref[...],
                preferred_element_type=jnp.float32)
    y = y + b_ref[...]

    @pl.when(l < n_layers - 1)
    def _():
        act_ref[slot_out] = jnp.maximum(y, 0.0).astype(act_ref.dtype)

    @pl.when(l == n_layers - 1)
    def _():
        o_ref[...] = y.astype(o_ref.dtype)


def pack_mlp_params(params, pad_dim):
    """Stack PyTorch-style (out, in) weights into a zero-padded, pre-transposed
    (L, pad_dim, pad_dim) bf16 tensor ((K, N) layout) and f32 biases (L, 1, pad_dim)."""
    num_layers = len(params)
    w_stack = jnp.zeros((num_layers, pad_dim, pad_dim), jnp.bfloat16)
    b_stack = jnp.zeros((num_layers, 1, pad_dim), jnp.float32)
    for l, (w, b) in enumerate(params):
        n, k = w.shape                                     # torch layout: (out, in)
        w_stack = w_stack.at[l, :k, :n].set(w.T.astype(jnp.bfloat16))
        b_stack = b_stack.at[l, 0, :n].set(b)
    return w_stack, b_stack


def mlp_forward(x, w_stack, b_stack, output_dim, *, tile_m=256):
    batch, in_dim = x.shape
    num_layers, pad_dim, _ = w_stack.shape

    m_pad = _round_up(max(batch, _SUBLANE_BF16), _SUBLANE_BF16)
    tm = min(tile_m, m_pad)
    m_pad = _round_up(m_pad, tm)
    grid_m = m_pad // tm

    # Zero-pad the input once (bf16); padded lanes stay exactly zero per layer.
    x_p = jnp.zeros((m_pad, pad_dim), jnp.bfloat16)
    x_p = x_p.at[:batch, :in_dim].set(x.astype(jnp.bfloat16))

    flops = 2 * num_layers * m_pad * pad_dim * pad_dim
    bytes_accessed = (
        x_p.size * 2
        + grid_m * (w_stack.size * 2 + b_stack.size * 4)   # weights re-fetched per M tile
        + m_pad * pad_dim * 4)

    # VMEM budget: double-buffered weight/bias/x/out blocks + ping-pong scratch,
    # ~25% headroom, clamped to leave room under v7x's 64 MiB physical VMEM.
    est = (2 * pad_dim * pad_dim * 2          # weights (double-buffered, bf16)
           + 2 * pad_dim * 4                  # biases
           + 2 * tm * pad_dim * 2             # x blocks
           + 2 * tm * pad_dim * 4             # out blocks (f32)
           + 2 * tm * pad_dim * 2)            # activation scratch
    vmem_bytes = min(48 << 20, max(32 << 20, int(1.25 * est)))

    out_p = pl.pallas_call(
        _fused_mlp_kernel,
        out_shape=jax.ShapeDtypeStruct((m_pad, pad_dim), jnp.float32),
        grid_spec=pltpu.PrefetchScalarGridSpec(
            num_scalar_prefetch=0,
            grid=(grid_m, num_layers),
            in_specs=[
                pl.BlockSpec((tm, pad_dim), lambda m, l: (m, 0)),
                pl.BlockSpec((None, pad_dim, pad_dim), lambda m, l: (l, 0, 0)),
                pl.BlockSpec((None, 1, pad_dim), lambda m, l: (l, 0, 0)),
            ],
            out_specs=pl.BlockSpec((tm, pad_dim), lambda m, l: (m, 0)),
            scratch_shapes=[pltpu.VMEM((2, tm, pad_dim), jnp.bfloat16)],
        ),
        compiler_params=pltpu.CompilerParams(
            dimension_semantics=("parallel", "arbitrary"),
            vmem_limit_bytes=vmem_bytes,
        ),
        cost_estimate=pl.CostEstimate(
            flops=flops, transcendentals=0, bytes_accessed=bytes_accessed),
    )(x_p, w_stack, b_stack)

    return out_p[:batch, :output_dim]


def init_mlp_params(key, input_dim, hidden_dim, output_dim, num_layers):
    """Deterministic init matching the PyTorch module's layer shapes.
    nn.Linear(n, k) -> weight (k, n), bias (k,), uniform(-1/sqrt(n), 1/sqrt(n))."""
    h = [hidden_dim] * (num_layers - 1)
    dims_in = [input_dim] + h
    dims_out = h + [output_dim]
    params = []
    for n, k in zip(dims_in, dims_out):
        key, kw, kb = jax.random.split(key, 3)
        bound = 1.0 / (n ** 0.5)
        w = jax.random.uniform(kw, (k, n), jnp.float32, -bound, bound)
        b = jax.random.uniform(kb, (k,), jnp.float32, -bound, bound)
        params.append((w, b))
    return params


if __name__ == "__main__":
    key = jax.random.PRNGKey(0)
    batch, input_dim, hidden_dim, output_dim, num_layers = 8, 32, 32, 16, 3

    key, kx, kp = jax.random.split(key, 3)
    x = jax.random.normal(kx, (batch, input_dim), jnp.float32)
    params = init_mlp_params(kp, input_dim, hidden_dim, output_dim, num_layers)

    pad_dim = _round_up(max(input_dim, hidden_dim, output_dim), _LANE)
    w_stack, b_stack = pack_mlp_params(params, pad_dim)

    out = mlp_forward(x, w_stack, b_stack, output_dim)
    jax.block_until_ready(out)

    # f32 reference (same semantics as the PyTorch forward).  The kernel uses
    # bf16 operands with f32 accumulation, so compare with a loosened tolerance.
    ref = x
    for i, (w, b) in enumerate(params):
        ref = ref @ w.T + b
        if i < num_layers - 1:
            ref = jnp.maximum(ref, 0.0)

    assert out.shape == (batch, output_dim)
    assert jnp.allclose(out, ref, atol=5e-2, rtol=5e-2), (
        float(jnp.max(jnp.abs(out - ref))))

    print("KERNEL_OK")
</pallas_src>

<mosaic_0001>
module attributes {stable_mosaic.version = 11 : i64} {
  func.func @_fused_mlp_kernel(%arg0: i32, %arg1: i32, %arg2: memref<16x128xbf16, #tpu.memory_space<vmem>>, %arg3: memref<1x128x128xbf16, #tpu.memory_space<vmem>>, %arg4: memref<1x1x128xf32, #tpu.memory_space<vmem>>, %arg5: memref<16x128xf32, #tpu.memory_space<vmem>>, %arg6: memref<2x16x128xbf16, #tpu.memory_space<vmem>>) attributes {dimension_semantics = [#tpu.dimension_semantics<parallel>, #tpu.dimension_semantics<arbitrary>], iteration_bounds = array<i64: 1, 3>, scalar_prefetch = 0 : i64, scratch_operands = 1 : i64, tpu.core_type = #tpu.core_type<tc>, window_params = [{transform_indices = @transform_0, window_bounds = array<i64: 16, 128>}, {transform_indices = @transform_1, window_bounds = array<i64: 1, 128, 128>}, {transform_indices = @transform_2, window_bounds = array<i64: 1, 1, 128>}, {transform_indices = @transform_3, window_bounds = array<i64: 16, 128>}]} {
    %c2_i32 = arith.constant 2 : i32
    %c0_i32 = arith.constant 0 : i32
    %0 = arith.cmpi eq, %c2_i32, %c0_i32 : i32
    %c1_i32 = arith.constant 1 : i32
    %1 = arith.select %0, %c1_i32, %c2_i32 : i32
    %2 = arith.remsi %arg1, %1 : i32
    %c0_i32_0 = arith.constant 0 : i32
    %3 = arith.cmpi ne, %2, %c0_i32_0 : i32
    %c0_i32_1 = arith.constant 0 : i32
    %4 = arith.cmpi slt, %2, %c0_i32_1 : i32
    %c0_i32_2 = arith.constant 0 : i32
    %5 = arith.cmpi slt, %1, %c0_i32_2 : i32
    %6 = arith.xori %4, %5 : i1
    %7 = arith.andi %6, %3 : i1
    %8 = arith.addi %2, %1 : i32
    %9 = arith.select %7, %8, %2 : i32
    %c1_i32_3 = arith.constant 1 : i32
    %10 = arith.addi %arg1, %c1_i32_3 : i32
    %c2_i32_4 = arith.constant 2 : i32
    %c0_i32_5 = arith.constant 0 : i32
    %11 = arith.cmpi eq, %c2_i32_4, %c0_i32_5 : i32
    %c1_i32_6 = arith.constant 1 : i32
    %12 = arith.select %11, %c1_i32_6, %c2_i32_4 : i32
    %13 = arith.remsi %10, %12 : i32
    %c0_i32_7 = arith.constant 0 : i32
    %14 = arith.cmpi ne, %13, %c0_i32_7 : i32
    %c0_i32_8 = arith.constant 0 : i32
    %15 = arith.cmpi slt, %13, %c0_i32_8 : i32
    %c0_i32_9 = arith.constant 0 : i32
    %16 = arith.cmpi slt, %12, %c0_i32_9 : i32
    %17 = arith.xori %15, %16 : i1
    %18 = arith.andi %17, %14 : i1
    %19 = arith.addi %13, %12 : i32
    %20 = arith.select %18, %19, %13 : i32
    %c0_i32_10 = arith.constant 0 : i32
    %21 = arith.cmpi eq, %arg1, %c0_i32_10 : i32
    %22 = arith.extui %21 : i1 to i32
    %c0_i32_11 = arith.constant 0 : i32
    %23 = arith.cmpi ne, %22, %c0_i32_11 : i32
    scf.if %23 {
      %c0_23 = arith.constant 0 : index
      %c0_24 = arith.constant 0 : index
      %40 = vector.load %arg2[%c0_23, %c0_24] : memref<16x128xbf16, #tpu.memory_space<vmem>>, vector<16x128xbf16>
      %c0_25 = arith.constant 0 : index
      %c0_26 = arith.constant 0 : index
      %c0_27 = arith.constant 0 : index
      %41 = vector.load %arg6[%c0_25, %c0_26, %c0_27] : memref<2x16x128xbf16, #tpu.memory_space<vmem>>, vector<1x16x128xbf16>
      %42 = vector.shape_cast %41 : vector<1x16x128xbf16> to vector<16x128xbf16>
      %43 = vector.shape_cast %40 : vector<16x128xbf16> to vector<1x16x128xbf16>
      tpu.vector_store %arg6[%c0_25, %c0_26, %c0_27], %43 {strides = array<i32>} : memref<2x16x128xbf16, #tpu.memory_space<vmem>>, vector<1x16x128xbf16>,
    } else {
    }
    %24 = arith.index_cast %9 : i32 to index
    %c0 = arith.constant 0 : index
    %c0_12 = arith.constant 0 : index
    %25 = vector.load %arg6[%24, %c0, %c0_12] : memref<2x16x128xbf16, #tpu.memory_space<vmem>>, vector<1x16x128xbf16>
    %26 = vector.shape_cast %25 : vector<1x16x128xbf16> to vector<16x128xbf16>
    %c0_13 = arith.constant 0 : index
    %c0_14 = arith.constant 0 : index
    %c0_15 = arith.constant 0 : index
    %27 = vector.load %arg3[%c0_13, %c0_14, %c0_15] : memref<1x128x128xbf16, #tpu.memory_space<vmem>>, vector<1x128x128xbf16>
    %28 = vector.shape_cast %27 : vector<1x128x128xbf16> to vector<128x128xbf16>
    %cst = arith.constant dense<0.000000e+00> : vector<16x128xf32>
    %29 = tpu.matmul %26, %28, %cst {dimension_numbers = #tpu.dot_dimension_numbers<[1], [0], [0], [1], [0, 0, 1, 1], [], []>} : vector<16x128xbf16>, vector<128x128xbf16>, vector<16x128xf32> -> vector<16x128xf32>
    %c0_16 = arith.constant 0 : index
    %c0_17 = arith.constant 0 : index
    %c0_18 = arith.constant 0 : index
    %30 = vector.load %arg4[%c0_16, %c0_17, %c0_18] : memref<1x1x128xf32, #tpu.memory_space<vmem>>, vector<1x1x128xf32>
    %31 = vector.shape_cast %30 : vector<1x1x128xf32> to vector<1x128xf32>
    %32 = vector.broadcast %31 : vector<1x128xf32> to vector<16x128xf32>
    %33 = arith.addf %29, %32 : vector<16x128xf32>
    %c2_i32_19 = arith.constant 2 : i32
    %34 = arith.cmpi slt, %arg1, %c2_i32_19 : i32
    %35 = arith.extui %34 : i1 to i32
    %c0_i32_20 = arith.constant 0 : i32
    %36 = arith.cmpi ne, %35, %c0_i32_20 : i32
    scf.if %36 {
      %cst_23 = arith.constant 0.000000e+00 : f32
      %40 = vector.broadcast %cst_23 : f32 to vector<16x128xf32>
      %41 = arith.maximumf %33, %40 : vector<16x128xf32>
      %42 = arith.truncf %41 : vector<16x128xf32> to vector<16x128xbf16>
      %43 = arith.index_cast %20 : i32 to index
      %c0_24 = arith.constant 0 : index
      %c0_25 = arith.constant 0 : index
      %44 = vector.load %arg6[%43, %c0_24, %c0_25] : memref<2x16x128xbf16, #tpu.memory_space<vmem>>, vector<1x16x128xbf16>
      %45 = vector.shape_cast %44 : vector<1x16x128xbf16> to vector<16x128xbf16>
      %46 = vector.shape_cast %42 : vector<16x128xbf16> to vector<1x16x128xbf16>
      tpu.vector_store %arg6[%43, %c0_24, %c0_25], %46 {strides = array<i32>} : memref<2x16x128xbf16, #tpu.memory_space<vmem>>, vector<1x16x128xbf16>,
    } else {
    }
    %c2_i32_21 = arith.constant 2 : i32
    %37 = arith.cmpi eq, %arg1, %c2_i32_21 : i32
    %38 = arith.extui %37 : i1 to i32
    %c0_i32_22 = arith.constant 0 : i32
    %39 = arith.cmpi ne, %38, %c0_i32_22 : i32
    scf.if %39 {
      %c0_23 = arith.constant 0 : index
      %c0_24 = arith.constant 0 : index
      %40 = vector.load %arg5[%c0_23, %c0_24] : memref<16x128xf32, #tpu.memory_space<vmem>>, vector<16x128xf32>
      tpu.vector_store %arg5[%c0_23, %c0_24], %33 {strides = array<i32>} : memref<16x128xf32, #tpu.memory_space<vmem>>, vector<16x128xf32>,
    } else {
    }
    return
  }
  func.func @transform_0(%arg0: i32, %arg1: i32) -> (i32, i32) {
    %c0_i32 = arith.constant 0 : i32
    %c0_i32_0 = arith.constant 0 : i32
    return %arg0, %c0_i32 : i32, i32
  }
  func.func @transform_1(%arg0: i32, %arg1: i32) -> (i32, i32, i32) {
    %c0_i32 = arith.constant 0 : i32
    %c0_i32_0 = arith.constant 0 : i32
    %c0_i32_1 = arith.constant 0 : i32
    return %arg1, %c0_i32, %c0_i32_0 : i32, i32, i32
  }
  func.func @transform_2(%arg0: i32, %arg1: i32) -> (i32, i32, i32) {
    %c0_i32 = arith.constant 0 : i32
    %c0_i32_0 = arith.constant 0 : i32
    %c0_i32_1 = arith.constant 0 : i32
    return %arg1, %c0_i32, %c0_i32_0 : i32, i32, i32
  }
  func.func @transform_3(%arg0: i32, %arg1: i32) -> (i32, i32) {
    %c0_i32 = arith.constant 0 : i32
    %c0_i32_0 = arith.constant 0 : i32
    return %arg0, %c0_i32 : i32, i32
  }
}

</mosaic_0001>

<bundles_post_ra>
// kernel: tpu_custom_call.1
= control target key start
LH: loop header
LB: loop body
LE: loop exit
PB: predicated region body
PF: predicated region fallthrough
CT: control target
= control target key end

     0   :  { %8 = vsyncpa [#allocation4], 0  ;;  %s1054_s0 = inlined_call_operand.hbm [shape: bf16[16,128], index: 0, kind: input, shape index: {}]   ;;  %s1055_s1 = inlined_call_operand.hbm [shape: bf16[3,128,128], index: 1, kind: input, shape index: {}]   ;;  %s1056_s2 = inlined_call_operand.vmem [shape: f32[3,1,128], index: 2, kind: input, shape index: {}]   ;;  %s1057_s3 = inlined_call_operand.hbm [shape: f32[16,128], index: 3, kind: output, shape index: {}]  }
   0x1   :  { %9 = vsyncpa [#allocation7], 0 }
   0x2   :  { %11 = vsyncpa [#allocation7 + $0x1], 0 }
   0x3   :  { %12 = vsyncpa [#allocation5], 0  ;;  %s829_s12 = smov 0   ;;  %s831_s13 = smov 0  }
   0x4   :  { %s833_s14 = smov 0   ;;  %s835_s15 = smov 0  }
   0x5   :  { %s837_s16 = smov 0   ;;  %s839_s17 = smov 0  }
   0x6 LB: > { %s503_s18 = sadd.s32 4294967295, %s798_s17   ;;  %p76_p0 = scmp.ne.s32.totalorder %s782_s13, %s778_s12  ;;  %s798_s17 = sphi %s839_s17, %s18_s17   ;;  %s794_s16 = sphi %s837_s16, %s1075_s16   ;;  %s790_s15 = sphi %s835_s15, %s1074_s15   ;;  %s786_s14 = sphi %s833_s14, %s1073_s14   ;;  %s782_s13 = sphi %s831_s13, %s1072_s13   ;;  %s778_s12 = sphi %s829_s12, %s1071_s12  }
   0x7   : > { %p861_p1 = scmp.eq.s32.totalorder %s503_s18, 0  ;;  %p504_p2 = scmp.ge.s32.totalorder %s798_s17, 1 }
   0x8   : > { %p139_p3 = scmp.lt.s32.totalorder %s798_s17, 4  ;;  %s800_s22 = smov [#allocation3]  }
   0x9   : > { %s1062_s19 = scalar_select %p861_p1, 1, 0 }
   0xa   : > { %p869_p4 = por %p861_p1, %p76_p0  ;;  %p873_p5 = pnand %p504_p2, %p139_p3 }
   0xb   : > { %s154_s23 = sshll.u32 %s800_s22, 4  ;;  %s27_s25 = sadd.s32 1, %s794_s16  ;;  %s155_s23 = int_to_ptr.vmem [resolvable:$true] %s154_s23 }
   0xc   : > { %s1063_s20 = scalar_select %p869_p4, 1, 0 }
   0xd   : > { %s1064_s21 = scalar_select %p873_p5, 1, 0 }
   0xe   : > { %p578_p6 = pneg %p873_p5  ;;  %s656_s28 = scalar_lea.hbm %s1054_s0, 128 }
   0xf   : > { %p657_p8 = scmp.ne.s32.totalorder %s1054_s0, %s656_s28  ;;  %p663_p12 = scmp.lt.u32.totalorder %s656_s28, %s1054_s0 }
  0x10   : > { %p881_p7 = pnand %p578_p6, %p861_p1 }
  0x12   : > { %p658_p9 = pneg %p881_p7 }
  0x14   : > { %p659_p10 = pnand %p658_p9, %p657_p8 }
  0x16   : > { %p660_p11 = pneg %p659_p10 }
  0x18   : > { %p665_p13 = pnand %p663_p12, %p660_p11 }
  0x1a   : > { %668 = shalt.err (!%p665_p13)
}
  0x1b   : > { %s669_s6 = scalar_lea.vmem %s155_s23, 128  ;;  %p677_p6 = scmp.lt.s32.totalorder %s155_s23, %s155_s23 }
  0x1c   : > { %p670_p0 = scmp.ne.s32.totalorder %s155_s23, %s669_s6  ;;  %p678_p4 = scmp.lt.s32.totalorder %s669_s6, %s669_s6 }
  0x1e   : > { %p672_p2 = pnand %p670_p0, %p658_p9  ;;  %p679_p1 = por %p678_p4, %p677_p6 }
  0x20   : > { %p673_p3 = pneg %p672_p2 }
  0x22   : > { %p680_p5 = pnand %p679_p1, %p673_p3 }
  0x24   : > { %683 = shalt.err (!%p680_p5)
}
  0x25   : > { %s801_s7 = smov 64   ;;  %s802_s8 = smov 4  }
  0x26   : > { %581 = dma.hbm_to_vmem [thread:$0]  (!%p881_p7), %s1054_s0, 128, %s155_s23, [#allocation4], %s801_s7, %s801_s7, %s802_s8  }
  0x27   : > { %p28_p1 = scmp.ge.s32.totalorder %s27_s25, 3  ;;  %s63_s11 = sadd.s32 1, %s786_s14 }
  0x28   : > { %p70_p4 = scmp.ne.s32.totalorder %s786_s14, %s782_s13  ;;  %p71_p5 = scmp.eq.s32.totalorder %s798_s17, 0 }
  0x29   : > { %s1077_s25 = smov (%p28_p1, %s27_s25), 0  ;;  %p587_p9 = scmp.lt.s32.totalorder %s798_s17, 3 }
  0x2a   : > { %p72_p8 = por %p71_p5, %p70_p4  ;;  %s60_s12 = ssub.s32 %s794_s16, %s1077_s25 }
  0x2b   : > { %s168_s22 = sand.u32 1, %s786_s14   ;;  %p61_p10 = scmp.eq.s32.totalorder %s60_s12, 0 }
  0x2c   : > { %s507_s24 = sshll.u32 %s168_s22, 6  ;;  %s538_s26 = sshll.u32 %s794_s16, 10 }
  0x2d   : > { %s917_s27 = scalar_select %p61_p10, %s786_s14, %s63_s11  }
  0x2e   : > { %s922_s23 = scalar_lea.hbm %s1055_s1, %s538_s26  ;;  %s172_s30 = scalar_lea.vmem [#allocation6], %s507_s24 }
  0x2f   : > { %s179_s4 = sshll.u32 %s172_s30, 4  ;;  %p924_p7 = pnand %p587_p9, %p72_p8  ;;  %s928_s4 = int_to_ptr.vmem [resolvable:$true] %s179_s4 }
  0x30   : > { %s930_s6 = scalar_lea.sflag [#allocation7], %s168_s22  ;;  %s684_s9 = scalar_lea.hbm %s922_s23, 1024 }
  0x31   : > { %p685_p11 = scmp.ne.s32.totalorder %s922_s23, %s684_s9  ;;  %p686_p12 = pneg %p924_p7 }
  0x32   : > { %s689_s12 = scalar_lea.hbm %s1055_s1, 3072  ;;  %p690_p2 = scmp.lt.u32.totalorder %s922_s23, %s1055_s1 }
  0x33   : > { %p687_p13 = pnand %p686_p12, %p685_p11  ;;  %p691_p3 = scmp.lt.u32.totalorder %s689_s12, %s684_s9 }
  0x34   : > { %p693_p1 = scmp.lt.u32.totalorder %s684_s9, %s922_s23 }
  0x35   : > { %p688_p0 = pneg %p687_p13  ;;  %p692_p6 = por %p691_p3, %p690_p2 }
  0x37   : > { %p694_p4 = por %p693_p1, %p692_p6 }
  0x39   : > { %p695_p5 = pnand %p694_p4, %p688_p0 }
  0x3b   : > { %698 = shalt.err (!%p695_p5)
}
  0x3c   : > { %s699_s22 = scalar_lea.vmem %s928_s4, 1024  ;;  %s803_s28 = smov [#allocation6]  }
  0x3d   : > { %p700_p8 = scmp.ne.s32.totalorder %s928_s4, %s699_s22  ;;  %s704_s29 = sshll.u32 %s803_s28, 4  ;;  %s705_s29 = int_to_ptr.vmem [resolvable:$false] %s704_s29 }
  0x3e   : > { %s706_s30 = scalar_lea.vmem %s705_s29, 2048  ;;  %p707_p11 = scmp.lt.s32.totalorder %s928_s4, %s705_s29 }
  0x3f   : > { %p702_p9 = pnand %p700_p8, %p686_p12  ;;  %p708_p13 = scmp.lt.s32.totalorder %s706_s30, %s699_s22 }
  0x41   : > { %p703_p10 = pneg %p702_p9  ;;  %p709_p2 = por %p708_p13, %p707_p11 }
  0x43   : > { %p710_p3 = pnand %p709_p2, %p703_p10 }
  0x45   : > { %713 = shalt.err (!%p710_p3)
}
  0x46   : > { %585 = dma.hbm_to_vmem [thread:$0]  (!%p924_p7), %s922_s23, 1024, %s928_s4, %s930_s6, %s801_s7, %s801_s7, %s802_s8  }
  0x47   : > { %p1067_p12 = scmp.ne.s32.totalorder %s1064_s21, 0 }
  0x48   : > { %p1068_p0 = scmp.ne.s32.totalorder (!%p1067_p12), %s1062_s19, 0 }
  0x49   : > { %197 = sbr.rel (%p1067_p12) target bundleno = 391 (0x187), region = 32 }
  0x50   : > { %765 = dma.done.wait (%p1068_p0), [#allocation4], 128  }
  0x51   : > { %767 = vsyncadd (%p1068_p0), [#allocation4], 4294967168  ;;  %s203_s9 = sand.u32 1, %s782_s13   ;;  %p1069_p6 = scmp.ne.s32.totalorder %s1063_s20, 0 }
  0x52   : > { %s512_s5 = sshll.u32 %s203_s9, 6  ;;  %s204_s10 = scalar_lea.sflag [#allocation7], %s203_s9 }
  0x53   : > { %s968_s11 = scalar_lea.vmem [#allocation6], %s512_s5 }
  0x54   : > { %769 = dma.done.wait (%p1069_p6), %s204_s10, 1024  }
  0x55   : > { %771 = vsyncadd (%p1069_p6), %s204_s10, 4294966272  ;;  %p229_p7 = scmp.lt.s32.totalorder %s790_s15, 2  ;;  %p234_p1 = scmp.lt.s32.totalorder %s790_s15, 0 }
  0x56   : > { %s235_s19 = ssub.s32 0, %s790_s15  ;;  %s246_s21 = sadd.s32 1, %s790_s15 }
  0x57   : > { %s979_s7 = scalar_select %p229_p7, %s790_s15, 2 }
  0x58   : > { %s513_s8 = smin.u32 %s790_s15, %s235_s19  ;;  %s248_s24 = ssub.s32 0, %s246_s21 }
  0x59   : > { %s231_s6 = scalar_lea.vmem %s1056_s2, %s979_s7  ;;  %s237_s20 = sand.u32 1, %s513_s8  }
  0x5a   : > { %s238_s12 = ssub.s32 0, %s237_s20  ;;  %p247_p4 = scmp.lt.s32.totalorder %s246_s21, 0 }
  0x5b   : > { %s1079_s12 = smov (!%p234_p1, %s238_s12), %s237_s20  ;;  %s516_s26 = smin.u32 %s248_s24, %s246_s21 }
  0x5c   : > { %p515_p5 = scmp.lt.s32.totalorder %s1079_s12, 0  ;;  %s244_s22 = sadd.s32 2, %s1079_s12 }
  0x5d   : > { %s250_s28 = sand.u32 1, %s516_s26   ;;  %p519_p9 = scmp.ne.s32.totalorder %s790_s15, 0 }
  0x5e   : > { %s1081_s22 = smov (!%p515_p5, %s244_s22), %s1079_s12  ;;  %s251_s29 = ssub.s32 0, %s250_s28  ;;  %v647_v0 = vld [vmem:[#allocation3] sm:$0xff] (!%p519_p9)  }
  0x5f   : > { %s1083_s29 = smov (!%p247_p4, %s251_s29), %s250_s28  ;;  %262 = sbr.rel (%p519_p9) target bundleno = 102 (0x66), region = 44 }
  0x60   : > { %p518_p8 = scmp.lt.s32.totalorder %s1083_s29, 0  ;;  %s257_s30 = sadd.s32 2, %s1083_s29  ;;  %271 = vst [vmem:[#allocation2] sm:$0xff] (!%p519_p9), %v647_v0 }
  0x62   : > { %s1085_s30 = smov (!%p518_p8, %s257_s30), %s1083_s29 }
  0x66 PF: > { %v648_v1 = vld [vmem:[%s968_s11] sm:$0xff]   ;;  %v804_v2 = vmov 0.0   ;;  %v649_v3 = vld [vmem:[%s968_s11 + $0x8] sm:$0xff]   ;;  %vm805_vm0 = vmmov 0   ;;  %v650_v4 = vld [vmem:[%s968_s11 + $0x10] sm:$0xff]   ;;  %s521_s9 = sshll.u32 %s1081_s22, 3 }
  0x67   : > { %548 = vmatprep.subr.bf16.mxu0 %v804_v2  ;;  %564 = vmatprep.mubr.msk.bf16.mxu0 %vm805_vm0, %v804_v2  ;;  %v651_v5 = vld [vmem:[%s968_s11 + $0x18] sm:$0xff]   ;;  %v652_v6 = vld [vmem:[%s968_s11 + $0x20] sm:$0xff]   ;;  %v653_v7 = vld [vmem:[%s968_s11 + $0x28] sm:$0xff]   ;;  %s273_s5 = scalar_lea.vmem [#allocation2], %s521_s9  ;;  %p531_p10 = scmp.ge.s32.totalorder %s790_s15, 2 }
  0x68   : > { %549 = vmatpush3.bf16.msra.mxu0 %v648_v1  ;;  %v654_v8 = vld [vmem:[%s968_s11 + $0x30] sm:$0xff]   ;;  %v655_v9 = vld [vmem:[%s968_s11 + $0x38] sm:$0xff]   ;;  %v274_v10 = vld [vmem:[%s273_s5] sm:$0xff]  ;;  %s532_s11 = sshll.u32 (!%p531_p10), %s1085_s30, 3 }
  0x69   : > { %550 = vmatprep.subr.bf16.mxu0 %v804_v2  ;;  %v522_v11 = vld [vmem:[%s231_s6] ss:$0 sm:$0xff]  ;;  %s395_s21 = scalar_lea.vmem (!%p531_p10), [#allocation2], %s532_s11 }
  0x6c   : > { %551 = vmatpush3.bf16.msra.mxu0 %v649_v3 }
  0x6d   : > { %552 = vmatprep.subr.bf16.mxu0 %v804_v2 }
  0x70   : > { %553 = vmatpush3.bf16.msra.mxu0 %v650_v4 }
  0x71   : > { %554 = vmatprep.subr.bf16.mxu0 %v804_v2 }
  0x74   : > { %555 = vmatpush3.bf16.msra.mxu0 %v651_v5 }
  0x75   : > { %556 = vmatprep.subr.bf16.mxu0 %v804_v2 }
  0x78   : > { %557 = vmatpush3.bf16.msra.mxu0 %v652_v6 }
  0x79   : > { %558 = vmatprep.subr.bf16.mxu0 %v804_v2 }
  0x7c   : > { %559 = vmatpush3.bf16.msra.mxu0 %v653_v7 }
  0x7d   : > { %560 = vmatprep.subr.bf16.mxu0 %v804_v2 }
  0x80   : > { %561 = vmatpush3.bf16.msra.mxu0 %v654_v8 }
  0x81   : > { %562 = vmatprep.subr.bf16.mxu0 %v804_v2 }
  0x84   : > { %563 = vmatpush3.bf16.msra.mxu0 %v655_v9 }
  0x87   : > { %565 = vmatmul.mubr.bf16.vlgmr.msra.gmra.mrb[0].mxu0 %v274_v10 }
 0x157   : > { %390 = sbr.rel (%p531_p10) target bundleno = 356 (0x164), region = 48 }
 0x15a   : > { %v380_v12 = vpop.f32.mrb[0].mxu0 }
 0x15b   : > { %v381_v13 = vadd.f32 %v522_v11, %v380_v12  ;;  %v566_v14 = vpop.f32.mrb[1].mxu0 }
 0x15c   : > { %v383_v15 = vpop.f32.mrb[2].mxu0 }
 0x15d   : > { %v384_v16 = vadd.f32 %v522_v11, %v383_v15  ;;  %v567_v17 = vpop.f32.mrb[3].mxu0  ;;  %v391_v18 = vmax.f32 (!%p531_p10), %v381_v13, 0.0 }
 0x15f   : > { %v392_v19 = vmax.f32 %v384_v16, 0.0 }
 0x161   : > { %v393_v20 = vpack.c.bf16 %v392_v19, %v391_v18 }
 0x163   : > { %396 = vst [vmem:[%s395_s21] sm:$0xff] %v393_v20 }
 0x164 PF: > { %p533_p11 = scmp.ne.s32.totalorder %s790_s15, 2 }
 0x165   : > { %401 = vst [vmem:[#allocation8] sm:$0xff] (!%p533_p11), %v381_v13  ;;  %402 = vst [vmem:[#allocation8 + $0x8] sm:$0xff] (!%p533_p11), %v384_v16 }
 0x166   : > { %400 = sbr.rel (%p533_p11) target bundleno = 365 (0x16d), region = 52 }
 0x16d PF: > { %p1010_p13 = scmp.eq.s32.totalorder %s503_s18, 2  ;;  %s806_s8 = smov [#allocation8]  }
 0x16e   : > { %s412_s23 = sshll.u32 %s806_s8, 4  ;;  %s413_s23 = int_to_ptr.vmem [resolvable:$true] %s412_s23 }
 0x16f   : > { %s714_s4 = scalar_lea.vmem %s413_s23, 256  ;;  %p721_p0 = scmp.lt.s32.totalorder %s413_s23, %s413_s23 }
 0x170   : > { %p715_p2 = scmp.ne.s32.totalorder %s413_s23, %s714_s4  ;;  %p722_p6 = scmp.lt.s32.totalorder %s714_s4, %s714_s4 }
 0x172   : > { %p716_p3 = pnand %p715_p2, %p1010_p13  ;;  %p723_p7 = por %p722_p6, %p721_p0 }
 0x174   : > { %p717_p12 = pneg %p716_p3 }
 0x176   : > { %p724_p1 = pnand %p723_p7, %p717_p12 }
 0x178   : > { %727 = shalt.err (!%p724_p1)
}
 0x179   : > { %s728_s18 = scalar_lea.hbm %s1057_s3, 256 }
 0x17a   : > { %p729_p4 = scmp.ne.s32.totalorder %s1057_s3, %s728_s18  ;;  %p734_p9 = scmp.lt.u32.totalorder %s728_s18, %s1057_s3 }
 0x17c   : > { %p730_p5 = pnand %p729_p4, %p1010_p13 }
 0x17e   : > { %p731_p8 = pneg %p730_p5 }
 0x180   : > { %p736_p10 = pnand %p734_p9, %p731_p8 }
 0x182   : > { %739 = shalt.err (!%p736_p10)
}
 0x183   : > { %s807_s22 = smov 128   ;;  %s808_s28 = smov 8  }
 0x184   : > { %575 = dma.vmem_to_hbm [thread:$0]  (%p1010_p13), %s413_s23, 256, %s1057_s3, [#allocation5], %s807_s22, %s807_s22, %s808_s28  }
 0x185   : > { %773 = dma.done.wait (%p1010_p13), [#allocation5], 256  }
 0x186   : > { %775 = vsyncadd (%p1010_p13), [#allocation5], 4294967040 }
 0x187 PF: > { %s18_s17 = sadd.s32 1, %s798_s17   ;;  %s1071_s12 = smov %s782_s13 }
 0x188   : > { %p15_p11 = scmp.ge.s32.totalorder %s18_s17, 5   ;;  %s1072_s13 = smov %s786_s14 }
 0x189   : > { %s1073_s14 = smov %s917_s27  ;;  %s1074_s15 = smov %s794_s16 }
 0x18a   : > { %s1075_s16 = smov %s1077_s25  ;;  %17 = sbr.rel (!%p15_p11) target bundleno = 6 (0x6), region = 93 }
 0x191   :  { %428 = vsyncpa [#allocation4], 1 }
 0x192   :  { %430 = vsyncpa [#allocation4 + $0x1], 1 }
 0x193   :  { %431 = vsyncpa [#allocation7], 1 }
 0x194   :  { %433 = vsyncpa [#allocation7 + $0x1], 1 }
 0x195   :  { %434 = vsyncpa [#allocation5], 1 }
 0x196   :  { %436 = vsyncpa [#allocation5 + $0x1], 1 }

</bundles_post_ra>
